<compile_context>
chip_gen: v5e
topology: v5e:2x2
jax: 0.10.0
libtpu: 0.0.40
codegen_flags: <defaults>
</compile_context>

<pallas_src>
import functools
import inspect

import jax
import jax.numpy as jnp
from jax.experimental import pallas as pl
from jax.experimental.pallas import tpu as pltpu


def _round_up(n, m):
    return ((n + m - 1) // m) * m


# Single-buffering of the resident weight operands needs BlockSpec.pipeline_mode;
# fall back to default double-buffering on JAX versions without it.
try:
    _HAS_PIPELINE_MODE = (
        hasattr(pl, "Buffered")
        and "pipeline_mode" in inspect.signature(pl.BlockSpec).parameters
    )
except (TypeError, ValueError):
    _HAS_PIPELINE_MODE = False


def _resident_spec(shape):
    """Full-array block whose index never changes across the batch grid."""
    if _HAS_PIPELINE_MODE:
        return pl.BlockSpec(shape, lambda i: (0, 0), pipeline_mode=pl.Buffered(1))
    return pl.BlockSpec(shape, lambda i: (0, 0))


def actor_kernel(x_ref, w1_ref, b1_ref, w2_ref, b2_ref, w3_ref, b3_ref,
                 out_ref, *, max_action):
    # Layer 1: relu(x @ W1 + b1)  — bf16 MXU matmul, f32 accumulate, VPU relu.
    h1 = jnp.dot(x_ref[...], w1_ref[...],
                 preferred_element_type=jnp.float32) + b1_ref[...]
    h1 = jnp.maximum(h1, 0.0).astype(jnp.bfloat16)
    # Layer 2: relu(h1 @ W2 + b2)
    h2 = jnp.dot(h1, w2_ref[...],
                 preferred_element_type=jnp.float32) + b2_ref[...]
    h2 = jnp.maximum(h2, 0.0).astype(jnp.bfloat16)
    # Layer 3: max_action * tanh(h2 @ W3 + b3)  — tanh lands on the EUP slot.
    h3 = jnp.dot(h2, w3_ref[...],
                 preferred_element_type=jnp.float32) + b3_ref[...]
    out_ref[...] = (max_action * jnp.tanh(h3)).astype(out_ref.dtype)


def prepare_actor_params(params):
    """One-time pad + bf16 cast of the weights.  Call once, reuse every step.

    Contraction (sublane) dims are rounded up to a multiple of 16 (bf16
    sublane packing); lane dims stay at their natural size and are passed as
    full-array blocks (Mosaic masks ragged lanes).  Biases stay f32.
    """
    w1, b1, w2, b2, w3, b3 = (params["w1"], params["b1"], params["w2"],
                              params["b2"], params["w3"], params["b3"])
    state_dim, h1_dim = w1.shape
    h2_dim = w2.shape[1]
    action_dim = w3.shape[1]

    Sp = _round_up(state_dim, 16)
    H1p = _round_up(h1_dim, 16)     # 400 -> 400
    H2p = _round_up(h2_dim, 16)     # 300 -> 304
    Ap = action_dim                 # natural size, full-array block

    bf16, f32 = jnp.bfloat16, jnp.float32
    w1p = jnp.zeros((Sp, H1p), bf16).at[:state_dim, :h1_dim].set(w1.astype(bf16))
    b1p = jnp.zeros((1, H1p), f32).at[0, :h1_dim].set(b1.astype(f32))
    w2p = jnp.zeros((H1p, H2p), bf16).at[:h1_dim, :h2_dim].set(w2.astype(bf16))
    b2p = jnp.zeros((1, H2p), f32).at[0, :h2_dim].set(b2.astype(f32))
    w3p = jnp.zeros((H2p, Ap), bf16).at[:h2_dim, :].set(w3.astype(bf16))
    b3p = b3.astype(f32).reshape(1, Ap)
    return {"w1": w1p, "b1": b1p, "w2": w2p, "b2": b2p, "w3": w3p, "b3": b3p}


@functools.partial(jax.jit, static_argnames=("max_action",))
def actor_forward(x, padded, *, max_action):
    """x: (B, state_dim) f32.  padded: output of prepare_actor_params."""
    w1p, b1p = padded["w1"], padded["b1"]
    w2p, b2p = padded["w2"], padded["b2"]
    w3p, b3p = padded["w3"], padded["b3"]

    B, state_dim = x.shape
    Sp, H1p = w1p.shape
    H2p = w2p.shape[1]
    Ap = w3p.shape[1]

    # Batch tiling:
    #  * B <= 128: one block, rounded to the bf16 packed-sublane tile (16 rows).
    #  * Training batches: large tiles (256..1024 rows) so the ~0.35 us
    #    per-grid-step overhead is amortized; bm ~ Bp//2 keeps >=2 steps on
    #    the "parallel" axis once B >= 512 so v7x's two TCs split the work.
    if B <= 128:
        bm = _round_up(B, 16)
    else:
        bm = min(1024, max(256, _round_up((B + 1) // 2, 16)))
    Bp = _round_up(B, bm)
    grid = (Bp // bm,)

    xp = jnp.zeros((Bp, Sp), jnp.bfloat16).at[:B, :state_dim].set(
        x.astype(jnp.bfloat16))

    flops = 2 * Bp * (Sp * H1p + H1p * H2p + H2p * Ap)
    bytes_accessed = (xp.size * 2 + w1p.size * 2 + w2p.size * 2 + w3p.size * 2
                      + (b1p.size + b2p.size + b3p.size) * 4 + Bp * Ap * 2)

    out_padded = pl.pallas_call(
        functools.partial(actor_kernel, max_action=float(max_action)),
        # bf16 output: the Ap lane dim is tiled to 128 lanes in HBM, so bf16
        # halves the padded writeback; cast back to f32 after un-padding.
        out_shape=jax.ShapeDtypeStruct((Bp, Ap), jnp.bfloat16),
        grid=grid,
        in_specs=[
            pl.BlockSpec((bm, Sp), lambda i: (i, 0)),  # x tile per grid step
            _resident_spec(w1p.shape),                 # weights stay resident,
            _resident_spec(b1p.shape),                 # single-buffered
            _resident_spec(w2p.shape),
            _resident_spec(b2p.shape),
            _resident_spec(w3p.shape),
            _resident_spec(b3p.shape),
        ],
        out_specs=pl.BlockSpec((bm, Ap), lambda i: (i, 0)),
        compiler_params=pltpu.CompilerParams(
            dimension_semantics=("parallel",),
            vmem_limit_bytes=32 << 20),
        cost_estimate=pl.CostEstimate(
            flops=flops, transcendentals=Bp * Ap,
            bytes_accessed=bytes_accessed),
    )(xp, w1p, b1p, w2p, b2p, w3p, b3p)

    return out_padded[:B, :Ap].astype(jnp.float32)


def init_actor_params(key, state_dim, action_dim):
    """Init mimicking PyTorch nn.Linear default: U[-1/sqrt(fan_in), 1/sqrt(fan_in)]."""
    def linear(key, fan_in, fan_out):
        kw, kb = jax.random.split(key)
        bound = 1.0 / jnp.sqrt(fan_in)
        w = jax.random.uniform(kw, (fan_in, fan_out), jnp.float32, -bound, bound)
        b = jax.random.uniform(kb, (fan_out,), jnp.float32, -bound, bound)
        return w, b

    k1, k2, k3 = jax.random.split(key, 3)
    w1, b1 = linear(k1, state_dim, 400)
    w2, b2 = linear(k2, 400, 300)
    w3, b3 = linear(k3, 300, action_dim)
    return {"w1": w1, "b1": b1, "w2": w2, "b2": b2, "w3": w3, "b3": b3}


def actor_forward_ref(x, params, max_action):
    """Pure-JAX f32 reference for sanity checking."""
    h = jnp.maximum(x @ params["w1"] + params["b1"], 0.0)
    h = jnp.maximum(h @ params["w2"] + params["b2"], 0.0)
    return max_action * jnp.tanh(h @ params["w3"] + params["b3"])


if __name__ == "__main__":
    key = jax.random.PRNGKey(0)
    k_params, k_x = jax.random.split(key)

    state_dim = 16
    action_dim = 4
    max_action = 2.0

    params = init_actor_params(k_params, state_dim, action_dim)
    prepared = prepare_actor_params(params)          # one-time pad + bf16 cast

    # Tiny inference batch (single-block path, bm=16).
    x_small = jax.random.normal(k_x, (2, state_dim), jnp.float32)
    out_small = jax.block_until_ready(
        actor_forward(x_small, prepared, max_action=max_action))
    ref_small = actor_forward_ref(x_small, params, max_action)
    assert out_small.shape == (2, action_dim), out_small.shape
    assert jnp.allclose(out_small, ref_small, atol=5e-2, rtol=5e-2), \
        "small-batch mismatch vs reference"

    # Training-sized batch (multi-step "parallel" grid path, bm=256, grid=(2,)).
    x_big = jax.random.normal(jax.random.PRNGKey(1), (512, state_dim), jnp.float32)
    out_big = jax.block_until_ready(
        actor_forward(x_big, prepared, max_action=max_action))
    ref_big = actor_forward_ref(x_big, params, max_action)
    assert out_big.shape == (512, action_dim), out_big.shape
    assert jnp.allclose(out_big, ref_big, atol=5e-2, rtol=5e-2), \
        "training-batch mismatch vs reference"

    print("KERNEL_OK")
</pallas_src>

<mosaic_0001>
module attributes {stable_mosaic.version = 11 : i64} {
  func.func @actor_kernel(%arg0: i32, %arg1: memref<16x16xbf16, #tpu.memory_space<vmem>>, %arg2: memref<16x400xbf16, #tpu.memory_space<vmem>>, %arg3: memref<1x400xf32, #tpu.memory_space<vmem>>, %arg4: memref<400x304xbf16, #tpu.memory_space<vmem>>, %arg5: memref<1x304xf32, #tpu.memory_space<vmem>>, %arg6: memref<304x4xbf16, #tpu.memory_space<vmem>>, %arg7: memref<1x4xf32, #tpu.memory_space<vmem>>, %arg8: memref<16x4xbf16, #tpu.memory_space<vmem>>) attributes {dimension_semantics = [#tpu.dimension_semantics<parallel>], iteration_bounds = array<i64: 1>, scalar_prefetch = 0 : i64, scratch_operands = 0 : i64, tpu.core_type = #tpu.core_type<tc>, window_params = [{transform_indices = @transform_0, window_bounds = array<i64: 16, 16>}, {pipeline_mode = #tpu.pipeline_mode<synchronous>, transform_indices = @transform_1, window_bounds = array<i64: 16, 400>}, {pipeline_mode = #tpu.pipeline_mode<synchronous>, transform_indices = @transform_2, window_bounds = array<i64: 1, 400>}, {pipeline_mode = #tpu.pipeline_mode<synchronous>, transform_indices = @transform_3, window_bounds = array<i64: 400, 304>}, {pipeline_mode = #tpu.pipeline_mode<synchronous>, transform_indices = @transform_4, window_bounds = array<i64: 1, 304>}, {pipeline_mode = #tpu.pipeline_mode<synchronous>, transform_indices = @transform_5, window_bounds = array<i64: 304, 4>}, {pipeline_mode = #tpu.pipeline_mode<synchronous>, transform_indices = @transform_6, window_bounds = array<i64: 1, 4>}, {transform_indices = @transform_7, window_bounds = array<i64: 16, 4>}]} {
    %c0 = arith.constant 0 : index
    %c0_0 = arith.constant 0 : index
    %0 = vector.load %arg1[%c0, %c0_0] : memref<16x16xbf16, #tpu.memory_space<vmem>>, vector<16x16xbf16>
    %c0_1 = arith.constant 0 : index
    %c0_2 = arith.constant 0 : index
    %1 = vector.load %arg2[%c0_1, %c0_2] : memref<16x400xbf16, #tpu.memory_space<vmem>>, vector<16x400xbf16>
    %cst = arith.constant dense<0.000000e+00> : vector<16x400xf32>
    %2 = tpu.matmul %0, %1, %cst {dimension_numbers = #tpu.dot_dimension_numbers<[1], [0], [0], [1], [0, 0, 1, 1], [], []>} : vector<16x16xbf16>, vector<16x400xbf16>, vector<16x400xf32> -> vector<16x400xf32>
    %c0_3 = arith.constant 0 : index
    %c0_4 = arith.constant 0 : index
    %3 = vector.load %arg3[%c0_3, %c0_4] : memref<1x400xf32, #tpu.memory_space<vmem>>, vector<1x400xf32>
    %4 = vector.broadcast %3 : vector<1x400xf32> to vector<16x400xf32>
    %5 = arith.addf %2, %4 : vector<16x400xf32>
    %cst_5 = arith.constant 0.000000e+00 : f32
    %6 = vector.broadcast %cst_5 : f32 to vector<16x400xf32>
    %7 = arith.maximumf %5, %6 : vector<16x400xf32>
    %8 = arith.truncf %7 : vector<16x400xf32> to vector<16x400xbf16>
    %c0_6 = arith.constant 0 : index
    %c0_7 = arith.constant 0 : index
    %9 = vector.load %arg4[%c0_6, %c0_7] : memref<400x304xbf16, #tpu.memory_space<vmem>>, vector<400x304xbf16>
    %cst_8 = arith.constant dense<0.000000e+00> : vector<16x304xf32>
    %10 = tpu.matmul %8, %9, %cst_8 {dimension_numbers = #tpu.dot_dimension_numbers<[1], [0], [0], [1], [0, 0, 1, 1], [], []>} : vector<16x400xbf16>, vector<400x304xbf16>, vector<16x304xf32> -> vector<16x304xf32>
    %c0_9 = arith.constant 0 : index
    %c0_10 = arith.constant 0 : index
    %11 = vector.load %arg5[%c0_9, %c0_10] : memref<1x304xf32, #tpu.memory_space<vmem>>, vector<1x304xf32>
    %12 = vector.broadcast %11 : vector<1x304xf32> to vector<16x304xf32>
    %13 = arith.addf %10, %12 : vector<16x304xf32>
    %cst_11 = arith.constant 0.000000e+00 : f32
    %14 = vector.broadcast %cst_11 : f32 to vector<16x304xf32>
    %15 = arith.maximumf %13, %14 : vector<16x304xf32>
    %16 = arith.truncf %15 : vector<16x304xf32> to vector<16x304xbf16>
    %c0_12 = arith.constant 0 : index
    %c0_13 = arith.constant 0 : index
    %17 = vector.load %arg6[%c0_12, %c0_13] : memref<304x4xbf16, #tpu.memory_space<vmem>>, vector<304x4xbf16>
    %cst_14 = arith.constant dense<0.000000e+00> : vector<16x4xf32>
    %18 = tpu.matmul %16, %17, %cst_14 {dimension_numbers = #tpu.dot_dimension_numbers<[1], [0], [0], [1], [0, 0, 1, 1], [], []>} : vector<16x304xbf16>, vector<304x4xbf16>, vector<16x4xf32> -> vector<16x4xf32>
    %c0_15 = arith.constant 0 : index
    %c0_16 = arith.constant 0 : index
    %19 = vector.load %arg7[%c0_15, %c0_16] : memref<1x4xf32, #tpu.memory_space<vmem>>, vector<1x4xf32>
    %20 = vector.broadcast %19 : vector<1x4xf32> to vector<16x4xf32>
    %21 = arith.addf %18, %20 : vector<16x4xf32>
    %22 = math.tanh %21 : vector<16x4xf32>
    %cst_17 = arith.constant 2.000000e+00 : f32
    %23 = vector.broadcast %cst_17 : f32 to vector<16x4xf32>
    %24 = arith.mulf %23, %22 : vector<16x4xf32>
    %25 = arith.truncf %24 : vector<16x4xf32> to vector<16x4xbf16>
    %c0_18 = arith.constant 0 : index
    %c0_19 = arith.constant 0 : index
    %26 = vector.load %arg8[%c0_18, %c0_19] : memref<16x4xbf16, #tpu.memory_space<vmem>>, vector<16x4xbf16>
    tpu.vector_store %arg8[%c0_18, %c0_19], %25 {strides = array<i32>} : memref<16x4xbf16, #tpu.memory_space<vmem>>, vector<16x4xbf16>,
    return
  }
  func.func @transform_0(%arg0: i32) -> (i32, i32) {
    %c0_i32 = arith.constant 0 : i32
    %c0_i32_0 = arith.constant 0 : i32
    return %arg0, %c0_i32 : i32, i32
  }
  func.func @transform_1(%arg0: i32) -> (i32, i32) {
    %c0_i32 = arith.constant 0 : i32
    %c0_i32_0 = arith.constant 0 : i32
    %c0_i32_1 = arith.constant 0 : i32
    return %c0_i32, %c0_i32_0 : i32, i32
  }
  func.func @transform_2(%arg0: i32) -> (i32, i32) {
    %c0_i32 = arith.constant 0 : i32
    %c0_i32_0 = arith.constant 0 : i32
    %c0_i32_1 = arith.constant 0 : i32
    return %c0_i32, %c0_i32_0 : i32, i32
  }
  func.func @transform_3(%arg0: i32) -> (i32, i32) {
    %c0_i32 = arith.constant 0 : i32
    %c0_i32_0 = arith.constant 0 : i32
    %c0_i32_1 = arith.constant 0 : i32
    return %c0_i32, %c0_i32_0 : i32, i32
  }
  func.func @transform_4(%arg0: i32) -> (i32, i32) {
    %c0_i32 = arith.constant 0 : i32
    %c0_i32_0 = arith.constant 0 : i32
    %c0_i32_1 = arith.constant 0 : i32
    return %c0_i32, %c0_i32_0 : i32, i32
  }
  func.func @transform_5(%arg0: i32) -> (i32, i32) {
    %c0_i32 = arith.constant 0 : i32
    %c0_i32_0 = arith.constant 0 : i32
    %c0_i32_1 = arith.constant 0 : i32
    return %c0_i32, %c0_i32_0 : i32, i32
  }
  func.func @transform_6(%arg0: i32) -> (i32, i32) {
    %c0_i32 = arith.constant 0 : i32
    %c0_i32_0 = arith.constant 0 : i32
    %c0_i32_1 = arith.constant 0 : i32
    return %c0_i32, %c0_i32_0 : i32, i32
  }
  func.func @transform_7(%arg0: i32) -> (i32, i32) {
    %c0_i32 = arith.constant 0 : i32
    %c0_i32_0 = arith.constant 0 : i32
    return %arg0, %c0_i32 : i32, i32
  }
}

</mosaic_0001>

<bundles_post_ra>
// kernel: actor_forward.1
= control target key start
LH: loop header
LB: loop body
LE: loop exit
PB: predicated region body
PF: predicated region fallthrough
CT: control target
= control target key end

     0   :  { %12 = vsyncpa [#allocation3], 0  ;;  %s1597_s27 = smov [#allocation2]   ;;  %s1598_s29 = smov 192   ;;  %s1774_s0 = inlined_call_operand.vmem [shape: bf16[16,16], index: 0, kind: input, shape index: {}]   ;;  %s1775_s1 = inlined_call_operand.vmem [shape: bf16[16,400], index: 1, kind: input, shape index: {}]   ;;  %s1776_s2 = inlined_call_operand.vmem [shape: f32[1,400], index: 2, kind: input, shape index: {}]   ;;  %s1777_s3 = inlined_call_operand.hbm [shape: bf16[400,304], index: 3, kind: input, shape index: {}]   ;;  %s1778_s4 = inlined_call_operand.vmem [shape: f32[1,304], index: 4, kind: input, shape index: {}]   ;;  %s1779_s5 = inlined_call_operand.vmem [shape: bf16[304,4], index: 5, kind: input, shape index: {}]   ;;  %s1780_s6 = inlined_call_operand.vmem [shape: f32[1,4], index: 6, kind: input, shape index: {}]   ;;  %s1781_s7 = inlined_call_operand.vmem [shape: bf16[16,4], index: 7, kind: output, shape index: {}]  }
   0x1   :  { %s23_s26 = sshll.u32 %s1777_s3, 4  ;;  %s25_s28 = sshll.u32 %s1597_s27, 4  ;;  %s24_s26 = int_to_ptr.hbm [resolvable:$true] %s23_s26  ;;  %s26_s28 = int_to_ptr.vmem [resolvable:$true] %s25_s28 }
   0x2   :  { %s1599_s30 = smov 12  }
   0x3   :  { %31 = dma.hbm_to_vmem [thread:$0]  %s24_s26, 9600, %s26_s28, [#allocation3], %s1598_s29, %s1598_s29, %s1599_s30  }
   0x4   :  { %1595 = dma.done.wait [#allocation3], 9600  }
   0x5   :  { %1596 = vsyncadd [#allocation3], 4294957696  ;;  %v1066_v0 = vld [vmem:[%s1775_s1] sm:$0xf]  ;;  %v1467_v1 = vld [vmem:[%s1775_s1 + $0xc] sm:$0xf0] }
   0x6   :  { %v1465_v2 = vld [vmem:[%s1775_s1 + $0x4] sm:$0xf]  ;;  %v1067_v3 = vor.u32 %v1467_v1, %v1066_v0  ;;  %v1068_v4 = vld [vmem:[%s1775_s1 + $0x10] sm:$0xf0]  ;;  %v1074_v5 = vld [vmem:[%s1775_s1 + $0x8] sm:$0xf] }
   0x7   :  { %v1468_v6 = vld [vmem:[%s1775_s1 + $0x14] sm:$0xf0]  ;;  %v1071_v7 = vor.u32 %v1465_v2, %v1068_v4  ;;  %v1466_v9 = vld [vmem:[%s1775_s1 + $0xc] sm:$0xf]  ;;  %v1076_v10 = vld [vmem:[%s1775_s1 + $0x18] sm:$0xf0] }
   0x8   :  { %v1075_v8 = vor.u32 %v1468_v6, %v1074_v5  ;;  %v1464_v11 = vld [vmem:[%s1774_s0] sm:$0xff]  ;;  %95 = vmatpush.bf16.msra.mxu0 %v1067_v3  ;;  %v1079_v12 = vor.u32 %v1466_v9, %v1076_v10  ;;  %vm84_vm0 = vcmask 130048   ;;  %v1170_v13 = vld [vmem:[#allocation2 + $0xa8] sm:$0xf]  ;;  %v1491_v14 = vld [vmem:[#allocation2 + $0xb0] sm:$0xf0] }
   0x9   :  { %109 = vmatpush.bf16.msra.mxu1 %v1071_v7  ;;  %v1171_v15 = vor.u32 %v1491_v14, %v1170_v13  ;;  %v1158_v16 = vld [vmem:[#allocation2 + $0x90] sm:$0xf]  ;;  %v1488_v17 = vld [vmem:[#allocation2 + $0x98] sm:$0xf0]  ;;  %v1266_v18 = vld [vmem:[#allocation2 + $0x168] sm:$0xf] }
   0xa   :  { %123 = vmatpush.bf16.msra.mxu2 %v1075_v8  ;;  %137 = vmatpush.bf16.msra.mxu3 %v1079_v12  ;;  %v1515_v19 = vld [vmem:[#allocation2 + $0x170] sm:$0xf0]  ;;  %v1254_v21 = vld [vmem:[#allocation2 + $0x150] sm:$0xf]  ;;  %v1512_v22 = vld [vmem:[#allocation2 + $0x158] sm:$0xf0]  ;;  %v1159_v23 = vor.u32 %v1488_v17, %v1158_v16 }
   0xb   :  { %1080 = vmatmul.msk.bf16.vlgmr.msra.gmra.mxu0 %vm84_vm0, %v1464_v11  ;;  %v1267_v20 = vor.u32 %v1515_v19, %v1266_v18  ;;  %v1146_v24 = vld [vmem:[#allocation2 + $0x78] sm:$0xf]  ;;  %v1485_v25 = vld [vmem:[#allocation2 + $0x80] sm:$0xf0]  ;;  %v1255_v26 = vor.u32 %v1512_v22, %v1254_v21  ;;  %v1362_v30 = vld [vmem:[#allocation2 + $0x228] sm:$0xf] }
   0xc   :  { %1081 = vmatmul.msk.bf16.vlgmr.msra.gmra.mxu1 %vm84_vm0, %v1464_v11  ;;  %667 = vmatpush.bf16.msrb.mxu0 %v1171_v15  ;;  %v1242_v27 = vld [vmem:[#allocation2 + $0x138] sm:$0xf]  ;;  %v1509_v28 = vld [vmem:[#allocation2 + $0x140] sm:$0xf0]  ;;  %v1147_v29 = vor.u32 %v1485_v25, %v1146_v24  ;;  %v1539_v31 = vld [vmem:[#allocation2 + $0x230] sm:$0xf0] }
   0xd   :  { %1082 = vmatmul.msk.bf16.vlgmr.msra.gmra.mxu2 %vm84_vm0, %v1464_v11  ;;  %1083 = vmatmul.msk.bf16.vlgmr.msra.gmra.mxu3 %vm84_vm0, %v1464_v11  ;;  %v1134_v32 = vld [vmem:[#allocation2 + $0x60] sm:$0xf]  ;;  %v1482_v33 = vld [vmem:[#allocation2 + $0x68] sm:$0xf0]  ;;  %v1243_v34 = vor.u32 %v1509_v28, %v1242_v27  ;;  %v1363_v36 = vor.u32 %v1539_v31, %v1362_v30  ;;  %v1172_v42 = vld [vmem:[#allocation2 + $0xb4] sm:$0xf0] }
   0xe   :  { %681 = vmatpush.bf16.msrb.mxu1 %v1267_v20  ;;  %v1230_v35 = vld [vmem:[#allocation2 + $0x120] sm:$0xf]  ;;  %v1506_v37 = vld [vmem:[#allocation2 + $0x128] sm:$0xf0]  ;;  %v1350_v43 = vld [vmem:[#allocation2 + $0x210] sm:$0xf]  ;;  %v1135_v44 = vor.u32 %v1482_v33, %v1134_v32 }
   0xf   :  { %v1374_v38 = vld [vmem:[#allocation2 + $0x240] sm:$0xf]  ;;  %v1542_v39 = vld [vmem:[#allocation2 + $0x248] sm:$0xf0]  ;;  %695 = vmatpush.bf16.msrb.mxu2 %v1363_v36  ;;  %v1122_v45 = vld [vmem:[#allocation2 + $0x48] sm:$0xf]  ;;  %v1231_v49 = vor.u32 %v1506_v37, %v1230_v35 }
  0x10   :  { %668 = vmatpush.bf16.msrb.mxu0 %v1159_v23  ;;  %v1375_v40 = vor.u32 %v1542_v39, %v1374_v38  ;;  %v1490_v41 = vld [vmem:[#allocation2 + $0xac] sm:$0xf]  ;;  %v1479_v46 = vld [vmem:[#allocation2 + $0x50] sm:$0xf0]  ;;  %v1536_v48 = vld [vmem:[#allocation2 + $0x218] sm:$0xf0] }
  0x11   :  { %v1175_v47 = vor.u32 %v1490_v41, %v1172_v42  ;;  %v1218_v50 = vld [vmem:[#allocation2 + $0x108] sm:$0xf]  ;;  %v1503_v51 = vld [vmem:[#allocation2 + $0x110] sm:$0xf0]  ;;  %v1351_v52 = vor.u32 %v1536_v48, %v1350_v43  ;;  %v1160_v54 = vld [vmem:[#allocation2 + $0x9c] sm:$0xf0]  ;;  %v1123_v59 = vor.u32 %v1479_v46, %v1122_v45 }
  0x12   :  { %682 = vmatpush.bf16.msrb.mxu1 %v1255_v26  ;;  %716 = vmatpush.bf16.msrb.mxu3 %v1375_v40  ;;  %v1487_v53 = vld [vmem:[#allocation2 + $0x94] sm:$0xf]  ;;  %v1338_v55 = vld [vmem:[#allocation2 + $0x1f8] sm:$0xf]  ;;  %v1533_v56 = vld [vmem:[#allocation2 + $0x200] sm:$0xf0]  ;;  %v1219_v62 = vor.u32 %v1503_v51, %v1218_v50 }
  0x13   :  { %696 = vmatpush.bf16.msrb.mxu2 %v1351_v52  ;;  %v1163_v57 = vor.u32 %v1487_v53, %v1160_v54  ;;  %v1339_v58 = vor.u32 %v1533_v56, %v1338_v55  ;;  %v1110_v60 = vld [vmem:[#allocation2 + $0x30] sm:$0xf]  ;;  %v1476_v61 = vld [vmem:[#allocation2 + $0x38] sm:$0xf0]  ;;  %v1098_v2 = vld [vmem:[#allocation2 + $0x18] sm:$0xf] }
  0x14   :  { %669 = vmatpush.bf16.msrb.mxu0 %v1147_v29  ;;  %v1206_v63 = vld [vmem:[#allocation2 + $0xf0] sm:$0xf]  ;;  %v1500_v0 = vld [vmem:[#allocation2 + $0xf8] sm:$0xf0]  ;;  %v1111_v1 = vor.u32 %v1476_v61, %v1110_v60  ;;  %v1473_v3 = vld [vmem:[#allocation2 + $0x20] sm:$0xf0] }
  0x15   :  { %v1207_v4 = vor.u32 %v1500_v0, %v1206_v63  ;;  %v1194_v5 = vld [vmem:[#allocation2 + $0xd8] sm:$0xf]  ;;  %v1497_v6 = vld [vmem:[#allocation2 + $0xe0] sm:$0xf0]  ;;  %v1099_v7 = vor.u32 %v1473_v3, %v1098_v2  ;;  %v1086_v8 = vld [vmem:[#allocation2] sm:$0xf] }
  0x16   :  { %683 = vmatpush.bf16.msrb.mxu1 %v1243_v34  ;;  %723 = vmatpush.bf16.msra.mxu3 %v1175_v47  ;;  %v1470_v9 = vld [vmem:[#allocation2 + $0x8] sm:$0xf0]  ;;  %v1195_v11 = vor.u32 %v1497_v6, %v1194_v5  ;;  %v1268_v12 = vld [vmem:[#allocation2 + $0x174] sm:$0xf0]  ;;  %v1182_v13 = vld [vmem:[#allocation2 + $0xc0] sm:$0xf] }
  0x17   :  { %697 = vmatpush.bf16.msrb.mxu2 %v1339_v58  ;;  %v1514_v10 = vld [vmem:[#allocation2 + $0x16c] sm:$0xf]  ;;  %v1087_v15 = vor.u32 %v1470_v9, %v1086_v8  ;;  %v1511_v18 = vld [vmem:[#allocation2 + $0x154] sm:$0xf]  ;;  %v1256_v19 = vld [vmem:[#allocation2 + $0x15c] sm:$0xf0] }
  0x18   :  { %670 = vmatpush.bf16.msrb.mxu0 %v1135_v44  ;;  %v1494_v14 = vld [vmem:[#allocation2 + $0xc8] sm:$0xf0]  ;;  %v1271_v16 = vor.u32 %v1514_v10, %v1268_v12  ;;  %v1259_v20 = vor.u32 %v1511_v18, %v1256_v19  ;;  %v1508_v21 = vld [vmem:[#allocation2 + $0x13c] sm:$0xf]  ;;  %v1244_v22 = vld [vmem:[#allocation2 + $0x144] sm:$0xf0] }
  0x19   :  { %v1183_v17 = vor.u32 %v1494_v14, %v1182_v13  ;;  %v1247_v23 = vor.u32 %v1508_v21, %v1244_v22  ;;  %v1505_v24 = vld [vmem:[#allocation2 + $0x124] sm:$0xf]  ;;  %v1232_v25 = vld [vmem:[#allocation2 + $0x12c] sm:$0xf0]  ;;  %v1538_v27 = vld [vmem:[#allocation2 + $0x22c] sm:$0xf] }
  0x1a   :  { %684 = vmatpush.bf16.msrb.mxu1 %v1231_v49  ;;  %724 = vmatpush.bf16.msra.mxu3 %v1163_v57  ;;  %v1235_v26 = vor.u32 %v1505_v24, %v1232_v25  ;;  %v1364_v28 = vld [vmem:[#allocation2 + $0x234] sm:$0xf0]  ;;  %v1484_v30 = vld [vmem:[#allocation2 + $0x7c] sm:$0xf]  ;;  %v1148_v31 = vld [vmem:[#allocation2 + $0x84] sm:$0xf0] }
  0x1b   :  { %v1367_v29 = vor.u32 %v1538_v27, %v1364_v28  ;;  %v1151_v32 = vor.u32 %v1484_v30, %v1148_v31  ;;  %v1326_v33 = vld [vmem:[#allocation2 + $0x1e0] sm:$0xf]  ;;  %v1530_v34 = vld [vmem:[#allocation2 + $0x1e8] sm:$0xf0]  ;;  %v1220_v37 = vld [vmem:[#allocation2 + $0x114] sm:$0xf0] }
  0x1c   :  { %671 = vmatpush.bf16.msrb.mxu0 %v1123_v59  ;;  %v1327_v35 = vor.u32 %v1530_v34, %v1326_v33  ;;  %v1502_v36 = vld [vmem:[#allocation2 + $0x10c] sm:$0xf]  ;;  %v1535_v39 = vld [vmem:[#allocation2 + $0x214] sm:$0xf]  ;;  %v1352_v40 = vld [vmem:[#allocation2 + $0x21c] sm:$0xf0] }
  0x1d   :  { %v1223_v38 = vor.u32 %v1502_v36, %v1220_v37  ;;  %v1355_v41 = vor.u32 %v1535_v39, %v1352_v40  ;;  %v1481_v42 = vld [vmem:[#allocation2 + $0x64] sm:$0xf]  ;;  %v1136_v43 = vld [vmem:[#allocation2 + $0x6c] sm:$0xf0]  ;;  %v1314_v45 = vld [vmem:[#allocation2 + $0x1c8] sm:$0xf] }
  0x1e   :  { %685 = vmatpush.bf16.msrb.mxu1 %v1219_v62  ;;  %725 = vmatpush.bf16.msra.mxu3 %v1151_v32  ;;  %v1139_v44 = vor.u32 %v1481_v42, %v1136_v43  ;;  %v1527_v46 = vld [vmem:[#allocation2 + $0x1d0] sm:$0xf0]  ;;  %v1208_v49 = vld [vmem:[#allocation2 + $0xfc] sm:$0xf0]  ;;  %v1532_v51 = vld [vmem:[#allocation2 + $0x1fc] sm:$0xf] }
  0x1f   :  { %698 = vmatpush.bf16.msrb.mxu2 %v1327_v35  ;;  %v1315_v47 = vor.u32 %v1527_v46, %v1314_v45  ;;  %v1499_v48 = vld [vmem:[#allocation2 + $0xf4] sm:$0xf]  ;;  %v1340_v52 = vld [vmem:[#allocation2 + $0x204] sm:$0xf0]  ;;  %v1478_v54 = vld [vmem:[#allocation2 + $0x4c] sm:$0xf] }
  0x20   :  { %672 = vmatpush.bf16.msrb.mxu0 %v1111_v1  ;;  %v1211_v50 = vor.u32 %v1499_v48, %v1208_v49  ;;  %v1343_v53 = vor.u32 %v1532_v51, %v1340_v52  ;;  %v1124_v55 = vld [vmem:[#allocation2 + $0x54] sm:$0xf0]  ;;  %v1302_v57 = vld [vmem:[#allocation2 + $0x1b0] sm:$0xf]  ;;  %v1524_v58 = vld [vmem:[#allocation2 + $0x1b8] sm:$0xf0] }
  0x21   :  { %v1127_v56 = vor.u32 %v1478_v54, %v1124_v55  ;;  %v1303_v59 = vor.u32 %v1524_v58, %v1302_v57  ;;  %v1496_v60 = vld [vmem:[#allocation2 + $0xdc] sm:$0xf]  ;;  %v1196_v61 = vld [vmem:[#allocation2 + $0xe4] sm:$0xf0]  ;;  %v1529_v63 = vld [vmem:[#allocation2 + $0x1e4] sm:$0xf] }
  0x22   :  { %686 = vmatpush.bf16.msrb.mxu1 %v1207_v4  ;;  %726 = vmatpush.bf16.msra.mxu3 %v1139_v44  ;;  %v1199_v62 = vor.u32 %v1496_v60, %v1196_v61  ;;  %v1328_v0 = vld [vmem:[#allocation2 + $0x1ec] sm:$0xf0]  ;;  %v1475_v2 = vld [vmem:[#allocation2 + $0x34] sm:$0xf]  ;;  %v1112_v3 = vld [vmem:[#allocation2 + $0x3c] sm:$0xf0] }
  0x23   :  { %699 = vmatpush.bf16.msrb.mxu2 %v1315_v47  ;;  %v1331_v1 = vor.u32 %v1529_v63, %v1328_v0  ;;  %v1115_v4 = vor.u32 %v1475_v2, %v1112_v3  ;;  %v1290_v5 = vld [vmem:[#allocation2 + $0x198] sm:$0xf]  ;;  %v1521_v6 = vld [vmem:[#allocation2 + $0x1a0] sm:$0xf0]  ;;  %v1184_v9 = vld [vmem:[#allocation2 + $0xcc] sm:$0xf0] }
  0x24   :  { %673 = vmatpush.bf16.msrb.mxu0 %v1099_v7  ;;  %v1291_v7 = vor.u32 %v1521_v6, %v1290_v5  ;;  %v1493_v8 = vld [vmem:[#allocation2 + $0xc4] sm:$0xf]  ;;  %v1316_v12 = vld [vmem:[#allocation2 + $0x1d4] sm:$0xf0]  ;;  %v1472_v14 = vld [vmem:[#allocation2 + $0x1c] sm:$0xf] }
  0x25   :  { %v1187_v10 = vor.u32 %v1493_v8, %v1184_v9  ;;  %v1518_v18 = vld [vmem:[#allocation2 + $0x188] sm:$0xf0]  ;;  %v1304_v21 = vld [vmem:[#allocation2 + $0x1bc] sm:$0xf0]  ;;  %v1088_v24 = vld [vmem:[#allocation2 + $0xc] sm:$0xf0] }
  0x26   :  { %687 = vmatpush.bf16.msrb.mxu1 %v1195_v11  ;;  %727 = vmatpush.bf16.msra.mxu3 %v1127_v56  ;;  %v1526_v11 = vld [vmem:[#allocation2 + $0x1cc] sm:$0xf]  ;;  %v1376_v27 = vld [vmem:[#allocation2 + $0x24c] sm:$0xf0]  ;;  %v1292_v30 = vld [vmem:[#allocation2 + $0x1a4] sm:$0xf0] }
  0x27   :  { %700 = vmatpush.bf16.msrb.mxu2 %v1303_v59  ;;  %v1319_v13 = vor.u32 %v1526_v11, %v1316_v12  ;;  %v1517_v32 = vld [vmem:[#allocation2 + $0x184] sm:$0xf]  ;;  %v1280_v33 = vld [vmem:[#allocation2 + $0x18c] sm:$0xf0]  ;;  %v49_v35 = vld [vmem:[%s1776_s2] sm:$0xf] }
  0x28   :  { %674 = vmatpush.bf16.msrb.mxu0 %v1087_v15  ;;  %v1100_v15 = vld [vmem:[#allocation2 + $0x24] sm:$0xf0]  ;;  %v1283_v34 = vor.u32 %v1517_v32, %v1280_v33  ;;  %v51_v37 = vperm.slane %v49_v35, 0  ;;  %v52_v39 = vperm.slane %v49_v35, 1  ;;  %v1370_v48 = vld [vmem:[#allocation2 + $0x230] sm:$0xf] }
  0x29   :  { %v1540_v49 = vld [vmem:[#allocation2 + $0x238] sm:$0xf0]  ;;  %v53_v51 = vperm.slane %v49_v35, 2  ;;  %v1382_v57 = vld [vmem:[#allocation2 + $0x248] sm:$0xf]  ;;  %vm1000_vm1 = vcmask 392192  }
  0x2a   :  { %688 = vmatpush.bf16.msrb.mxu1 %v1183_v17  ;;  %728 = vmatpush.bf16.msra.mxu3 %v1115_v4  ;;  %v1278_v17 = vld [vmem:[#allocation2 + $0x180] sm:$0xf]  ;;  %v1371_v56 = vor.u32 %v1540_v49, %v1370_v48  ;;  %v1543_v58 = vld [vmem:[#allocation2 + $0x250] sm:$0xf0]  ;;  %v1358_v60 = vld [vmem:[#allocation2 + $0x218] sm:$0xf] }
  0x2b   :  { %701 = vmatpush.bf16.msrb.mxu2 %v1291_v7  ;;  %v1279_v19 = vor.u32 %v1518_v18, %v1278_v17  ;;  %v1537_v61 = vld [vmem:[#allocation2 + $0x220] sm:$0xf0]  ;;  %v1178_v6 = vld [vmem:[#allocation2 + $0xb0] sm:$0xf]  ;;  %v1492_v7 = vld [vmem:[#allocation2 + $0xb8] sm:$0xf0] }
  0x2c   :  { %737 = vmatpush.bf16.msra.mxu0 %v1271_v16  ;;  %v1103_v16 = vor.u32 %v1472_v14, %v1100_v15  ;;  %v1359_v5 = vor.u32 %v1537_v61, %v1358_v60  ;;  %v1274_v8 = vld [vmem:[#allocation2 + $0x170] sm:$0xf]  ;;  %v1346_v11 = vld [vmem:[#allocation2 + $0x200] sm:$0xf]  ;;  %v1534_v12 = vld [vmem:[#allocation2 + $0x208] sm:$0xf0]  ;;  %v1179_v17 = vor.u32 %v1492_v7, %v1178_v6 }
  0x2d   :  { %v1486_v32 = vld [vmem:[#allocation2 + $0x88] sm:$0xf0]  ;;  %v1250_v33 = vld [vmem:[#allocation2 + $0x140] sm:$0xf]  ;;  %v1130_v49 = vld [vmem:[#allocation2 + $0x50] sm:$0xf] }
  0x2e   :  { %751 = vmatpush.bf16.msra.mxu1 %v1367_v29  ;;  %729 = vmatpush.bf16.msra.mxu3 %v1103_v16  ;;  %v1520_v29 = vld [vmem:[#allocation2 + $0x19c] sm:$0xf]  ;;  %v1477_v60 = vld [vmem:[#allocation2 + $0x40] sm:$0xf0]  ;;  %v1474_v6 = vld [vmem:[#allocation2 + $0x28] sm:$0xf0] }
  0x2f   :  { %702 = vmatpush.bf16.msrb.mxu2 %v1279_v19  ;;  %v1295_v31 = vor.u32 %v1520_v29, %v1292_v30  ;;  %vm1052_vm2 = vcmask 27648  }
  0x30   :  { %738 = vmatpush.bf16.msra.mxu0 %v1259_v20  ;;  %v1523_v20 = vld [vmem:[#allocation2 + $0x1b4] sm:$0xf] }
  0x31   :  { %v1307_v22 = vor.u32 %v1523_v20, %v1304_v21  ;;  %v1347_v20 = vor.u32 %v1534_v12, %v1346_v11  ;;  %v1166_v21 = vld [vmem:[#allocation2 + $0x98] sm:$0xf]  ;;  %v1094_v12 = vld [vmem:[#allocation2 + $0x8] sm:$0xf] }
  0x32   :  { %752 = vmatpush.bf16.msra.mxu1 %v1355_v41 }
  0x34   :  { %739 = vmatpush.bf16.msra.mxu0 %v1247_v23  ;;  %v1469_v23 = vld [vmem:[#allocation2 + $0x4] sm:$0xf] }
  0x35   :  { %v1091_v25 = vor.u32 %v1469_v23, %v1088_v24  ;;  %v1262_v23 = vld [vmem:[#allocation2 + $0x158] sm:$0xf] }
  0x36   :  { %753 = vmatpush.bf16.msra.mxu1 %v1343_v53  ;;  %v54_v53 = vperm.slane %v49_v35, 3  ;;  %v1322_v35 = vld [vmem:[#allocation2 + $0x1d0] sm:$0xf] }
  0x37   :  { %730 = vmatpush.bf16.msra.mxu3 %v1091_v25  ;;  %v1513_v25 = vld [vmem:[#allocation2 + $0x160] sm:$0xf0] }
  0x38   :  { %740 = vmatpush.bf16.msra.mxu0 %v1235_v26  ;;  %v1541_v26 = vld [vmem:[#allocation2 + $0x244] sm:$0xf]  ;;  %v1263_v29 = vor.u32 %v1513_v25, %v1262_v23  ;;  %v1558_v23 = vld [vmem:[%s1779_s5 + $0x70] sm:$0xff]  ;;  %v1557_v25 = vld [vmem:[%s1779_s5 + $0x68] sm:$0xff] }
  0x39   :  { %v1379_v28 = vor.u32 %v1541_v26, %v1376_v27  ;;  %v1334_v26 = vld [vmem:[#allocation2 + $0x1e8] sm:$0xf]  ;;  %v1531_v27 = vld [vmem:[#allocation2 + $0x1f0] sm:$0xf0] }
  0x3a   :  { %754 = vmatpush.bf16.msra.mxu1 %v1331_v1  ;;  %v1335_v30 = vor.u32 %v1531_v27, %v1334_v26  ;;  %v1556_v26 = vld [vmem:[%s1779_s5 + $0x60] sm:$0xff]  ;;  %v1555_v27 = vld [vmem:[%s1779_s5 + $0x58] sm:$0xff] }
  0x3b   :  { %772 = vmatpush.bf16.msra.mxu2 %v1379_v28 }
  0x3c   :  { %741 = vmatpush.bf16.msra.mxu0 %v1223_v38 }
  0x3e   :  { %755 = vmatpush.bf16.msra.mxu1 %v1319_v13 }
  0x40   :  { %742 = vmatpush.bf16.msra.mxu0 %v1211_v50 }
  0x42   :  { %756 = vmatpush.bf16.msra.mxu1 %v1307_v22  ;;  %v1489_v22 = vld [vmem:[#allocation2 + $0xa0] sm:$0xf0] }
  0x43   :  { %v1167_v28 = vor.u32 %v1489_v22, %v1166_v21  ;;  %v1559_v21 = vld [vmem:[%s1779_s5 + $0x78] sm:$0xff]  ;;  %v1545_v22 = vld [vmem:[%s1779_s5 + $0x8] sm:$0xff] }
  0x44   :  { %743 = vmatpush.bf16.msra.mxu0 %v1199_v62  ;;  %v1383_v62 = vor.u32 %v1543_v58, %v1382_v57  ;;  %v1118_v58 = vld [vmem:[#allocation2 + $0x38] sm:$0xf] }
  0x46   :  { %757 = vmatpush.bf16.msra.mxu1 %v1295_v31  ;;  %v1154_v31 = vld [vmem:[#allocation2 + $0x80] sm:$0xf] }
  0x48   :  { %744 = vmatpush.bf16.msra.mxu0 %v1187_v10  ;;  %v1516_v10 = vld [vmem:[#allocation2 + $0x178] sm:$0xf0] }
  0x49   :  { %v1275_v19 = vor.u32 %v1516_v10, %v1274_v8  ;;  %v1202_v8 = vld [vmem:[#allocation2 + $0xe0] sm:$0xf] }
  0x4a   :  { %758 = vmatpush.bf16.msra.mxu1 %v1283_v34  ;;  %v1510_v34 = vld [vmem:[#allocation2 + $0x148] sm:$0xf0] }
  0x88   :  { %v97_v36 = vpop.f32.mrf.mxu0 }
  0x89   :  { %v111_v38 = vpop.f32.mrf.mxu1  ;;  %v98_v40 = vadd.f32 %v97_v36, %v51_v37  ;;  %v1528_v36 = vld [vmem:[#allocation2 + $0x1d8] sm:$0xf0] }
  0x8a   :  { %v112_v41 = vadd.f32 %v111_v38, %v52_v39  ;;  %v1251_v38 = vor.u32 %v1510_v34, %v1250_v33  ;;  %v1553_v34 = vld [vmem:[%s1779_s5 + $0x48] sm:$0xff] }
  0x8b   :  { %v144_v45 = vmax.f32 %v98_v40, 0.0  ;;  %v1483_v40 = vld [vmem:[#allocation2 + $0x70] sm:$0xf0] }
  0x8c   :  { %v145_v50 = vmax.f32 %v112_v41, 0.0  ;;  %v1323_v41 = vor.u32 %v1528_v36, %v1322_v35 }
  0x90   :  { %v125_v42 = vpop.f32.mrf.mxu2  ;;  %v139_v43 = vpop.f32.mrf.mxu3 }
  0x91   :  { %v99_v44 = vpop.f32.mrf.mxu0  ;;  %v113_v47 = vpop.f32.mrf.mxu1  ;;  %v126_v63 = vadd.f32 %v125_v42, %v53_v51  ;;  %v140_v1 = vadd.f32 %v139_v43, %v54_v53  ;;  %v1238_v42 = vld [vmem:[#allocation2 + $0x128] sm:$0xf]  ;;  %v1507_v43 = vld [vmem:[#allocation2 + $0x130] sm:$0xf0] }
  0x92   :  { %v100_v46 = vadd.f32 %v99_v44, %v51_v37  ;;  %v114_v52 = vadd.f32 %v113_v47, %v52_v39  ;;  %v1155_v37 = vor.u32 %v1486_v32, %v1154_v31  ;;  %v1142_v39 = vld [vmem:[#allocation2 + $0x68] sm:$0xf]  ;;  %v1551_v44 = vld [vmem:[%s1779_s5 + $0x38] sm:$0xff]  ;;  %v1239_v48 = vor.u32 %v1507_v43, %v1238_v42  ;;  %v1554_v31 = vld [vmem:[%s1779_s5 + $0x50] sm:$0xff] }
  0x93   :  { %v146_v13 = vmax.f32 %v126_v63, 0.0  ;;  %v147_v15 = vmax.f32 %v140_v1, 0.0  ;;  %v1143_v47 = vor.u32 %v1483_v40, %v1142_v39  ;;  %v1501_v63 = vld [vmem:[#allocation2 + $0x100] sm:$0xf0]  ;;  %v1286_v1 = vld [vmem:[#allocation2 + $0x188] sm:$0xf] }
  0x94   :  { %v148_v54 = vmax.f32 %v100_v46, 0.0  ;;  %v149_v55 = vmax.f32 %v114_v52, 0.0  ;;  %v1525_v46 = vld [vmem:[#allocation2 + $0x1c0] sm:$0xf0]  ;;  %v1226_v52 = vld [vmem:[#allocation2 + $0x110] sm:$0xf] }
  0x95   :  { %v1552_v39 = vld [vmem:[%s1779_s5 + $0x40] sm:$0xff] }
  0x96   :  { %v1677_v59 = vpack.c.bf16 %v148_v54, %v144_v45  ;;  %v1679_v0 = vpack.c.bf16 %v149_v55, %v145_v50  ;;  %v1310_v45 = vld [vmem:[#allocation2 + $0x1b8] sm:$0xf]  ;;  %v1480_v50 = vld [vmem:[#allocation2 + $0x58] sm:$0xf0]  ;;  %v1298_v54 = vld [vmem:[#allocation2 + $0x1a0] sm:$0xf] }
  0x97   :  { %v1522_v55 = vld [vmem:[#allocation2 + $0x1a8] sm:$0xf0] }
  0x98   :  { %v127_v2 = vpop.f32.mrf.mxu2  ;;  %675 = vmatmul.bf16.vlgmr.msrb.gmra.mxu0 %v1677_v59  ;;  %v141_v4 = vpop.f32.mrf.mxu3  ;;  %689 = vmatmul.bf16.vlgmr.msrb.gmra.mxu1 %v1679_v0  ;;  %v1299_v61 = vor.u32 %v1522_v55, %v1298_v54 }
  0x99   :  { %v128_v3 = vadd.f32 %v127_v2, %v53_v51  ;;  %807 = vmatpush.bf16.msrb.mxu0 %v1371_v56  ;;  %v142_v9 = vadd.f32 %v141_v4, %v54_v53  ;;  %828 = vmatpush.bf16.msrb.mxu1 %v1383_v62  ;;  %v1311_v51 = vor.u32 %v1525_v46, %v1310_v45  ;;  %v1504_v53 = vld [vmem:[#allocation2 + $0x118] sm:$0xf0]  ;;  %v1214_v62 = vld [vmem:[#allocation2 + $0xf8] sm:$0xf]  ;;  %v1519_v2 = vld [vmem:[#allocation2 + $0x190] sm:$0xf0] }
  0x9a   :  { %v1131_v56 = vor.u32 %v1480_v50, %v1130_v49  ;;  %v1227_v57 = vor.u32 %v1504_v53, %v1226_v52  ;;  %v1215_v4 = vor.u32 %v1501_v63, %v1214_v62  ;;  %v1287_v7 = vor.u32 %v1519_v2, %v1286_v1  ;;  %v1561_v52 = vld [vmem:[%s1779_s5 + $0x88] sm:$0xff] }
  0x9b   :  { %v150_v14 = vmax.f32 %v128_v3, 0.0  ;;  %v151_v16 = vmax.f32 %v142_v9, 0.0  ;;  %v1119_v3 = vor.u32 %v1477_v60, %v1118_v58  ;;  %v1498_v9 = vld [vmem:[#allocation2 + $0xe8] sm:$0xf0]  ;;  %v1560_v60 = vld [vmem:[%s1779_s5 + $0x80] sm:$0xff] }
  0x9c   :  { %v1203_v11 = vor.u32 %v1498_v9, %v1202_v8 }
  0x9d   :  { %v1683_v18 = vpack.c.bf16 %v150_v14, %v146_v13  ;;  %808 = vmatpush.bf16.msrb.mxu0 %v1359_v5  ;;  %v1685_v24 = vpack.c.bf16 %v151_v16, %v147_v15  ;;  %v1106_v5 = vld [vmem:[#allocation2 + $0x20] sm:$0xf]  ;;  %v1471_v13 = vld [vmem:[#allocation2 + $0x10] sm:$0xf0]  ;;  %v1190_v14 = vld [vmem:[#allocation2 + $0xc8] sm:$0xf] }
  0x9e   :  { %v1107_v10 = vor.u32 %v1474_v6, %v1106_v5  ;;  %v1495_v15 = vld [vmem:[#allocation2 + $0xd0] sm:$0xf0]  ;;  %v1095_v16 = vor.u32 %v1471_v13, %v1094_v12 }
  0x9f   :  { %703 = vmatmul.bf16.vlgmr.msrb.gmra.mxu2 %v1683_v18  ;;  %1384 = vmatmul.msk.bf16.vlgmr.msrb.gmra.mxu3 %vm84_vm0, %v1685_v24 }
  0xa0   :  { %779 = vmatpush.bf16.msrb.mxu2 %v1179_v17  ;;  %793 = vmatpush.bf16.msrb.mxu3 %v1275_v19  ;;  %v1191_v17 = vor.u32 %v1495_v15, %v1190_v14  ;;  %v1550_v19 = vld [vmem:[%s1779_s5 + $0x30] sm:$0xff] }
  0xa1   :  { %809 = vmatpush.bf16.msrb.mxu0 %v1347_v20  ;;  %v1549_v20 = vld [vmem:[%s1779_s5 + $0x28] sm:$0xff] }
  0xa4   :  { %780 = vmatpush.bf16.msrb.mxu2 %v1167_v28  ;;  %794 = vmatpush.bf16.msrb.mxu3 %v1263_v29  ;;  %v1742_v28 = vld [vmem:[%s1778_s4] sm:$0x7] }
  0xa5   :  { %810 = vmatpush.bf16.msrb.mxu0 %v1335_v30  ;;  %v258_v30 = vperm.slane %v1742_v28, 0  ;;  %v259_v54 = vperm.slane %v1742_v28, 1 }
  0xa8   :  { %781 = vmatpush.bf16.msrb.mxu2 %v1155_v37  ;;  %745 = vmatmul.bf16.vlgmr.msra.gmra.mxu0 %v1679_v0 }
  0xa9   :  { %795 = vmatpush.bf16.msrb.mxu3 %v1251_v38  ;;  %759 = vmatmul.bf16.vlgmr.msra.gmra.mxu1 %v1683_v18 }
  0xaa   :  { %811 = vmatpush.bf16.msrb.mxu0 %v1323_v41  ;;  %1004 = vmatpush.bf16.msra.mxu1 %v1551_v44 }
  0xac   :  { %782 = vmatpush.bf16.msrb.mxu2 %v1143_v47 }
  0xad   :  { %796 = vmatpush.bf16.msrb.mxu3 %v1239_v48  ;;  %v1562_v48 = vld [vmem:[%s1779_s5 + $0x90] sm:$0xff] }
  0xae   :  { %812 = vmatpush.bf16.msrb.mxu0 %v1311_v51  ;;  %1005 = vmatpush.bf16.msra.mxu1 %v1550_v19 }
  0xaf   :  { %1385 = vmatmul.msk.bf16.vlgmr.msra.gmra.mxu2 %vm84_vm0, %v1685_v24  ;;  %731 = vmatmul.bf16.vlgmr.msra.gmra.mxu3 %v1677_v59 }
  0xb0   :  { %783 = vmatpush.bf16.msrb.mxu2 %v1131_v56 }
  0xb1   :  { %797 = vmatpush.bf16.msrb.mxu3 %v1227_v57 }
  0xb2   :  { %813 = vmatpush.bf16.msrb.mxu0 %v1299_v61  ;;  %1006 = vmatpush.bf16.msra.mxu1 %v1549_v20 }
  0xb4   :  { %784 = vmatpush.bf16.msrb.mxu2 %v1119_v3 }
  0xb5   :  { %798 = vmatpush.bf16.msrb.mxu3 %v1215_v4 }
  0xb6   :  { %814 = vmatpush.bf16.msrb.mxu0 %v1287_v7  ;;  %v260_v7 = vperm.slane %v1742_v28, 2 }
  0xb8   :  { %785 = vmatpush.bf16.msrb.mxu2 %v1107_v10 }
  0xb9   :  { %799 = vmatpush.bf16.msrb.mxu3 %v1203_v11  ;;  %815 = vmatmul.bf16.vlgmr.msrb.gmra.mxu0 %v1683_v18  ;;  %v1548_v18 = vld [vmem:[%s1779_s5 + $0x20] sm:$0xff] }
  0xba   :  { %1386 = vmatmul.msk.bf16.vlgmr.msrb.gmra.mxu1 %vm84_vm0, %v1685_v24  ;;  %v1544_v24 = vld [vmem:[%s1779_s5] sm:$0xff] }
  0xbb   :  { %1007 = vmatpush.bf16.msra.mxu1 %v1548_v18 }
  0xbc   :  { %786 = vmatpush.bf16.msrb.mxu2 %v1095_v16 }
  0xbd   :  { %800 = vmatpush.bf16.msrb.mxu3 %v1191_v17 }
  0xbf   :  { %787 = vmatmul.bf16.vlgmr.msrb.gmra.mxu2 %v1677_v59  ;;  %v1547_v59 = vld [vmem:[%s1779_s5 + $0x18] sm:$0xff] }
  0xc0   :  { %801 = vmatmul.bf16.vlgmr.msrb.gmra.mxu3 %v1679_v0  ;;  %1008 = vmatpush.bf16.msra.mxu1 %v1547_v59  ;;  %v1546_v0 = vld [vmem:[%s1779_s5 + $0x10] sm:$0xff] }
  0xc1   :  { %1018 = vmatpush.bf16.msra.mxu2 %v1559_v21  ;;  %1037 = vmatpush.bf16.msra.mxu3 %v1562_v48 }
  0xc4   :  { %1009 = vmatpush.bf16.msra.mxu1 %v1546_v0 }
  0xc5   :  { %1019 = vmatpush.bf16.msra.mxu2 %v1558_v23  ;;  %1038 = vmatpush.bf16.msra.mxu3 %v1561_v52 }
  0xc8   :  { %1010 = vmatpush.bf16.msra.mxu1 %v1545_v22 }
  0xc9   :  { %1020 = vmatpush.bf16.msra.mxu2 %v1557_v25  ;;  %1039 = vmatpush.bf16.msra.mxu3 %v1560_v60 }
  0xcc   :  { %1011 = vmatpush.bf16.msra.mxu1 %v1544_v24 }
  0xcd   :  { %1021 = vmatpush.bf16.msra.mxu2 %v1556_v26 }
  0xd1   :  { %1022 = vmatpush.bf16.msra.mxu2 %v1555_v27 }
  0xd5   :  { %1023 = vmatpush.bf16.msra.mxu2 %v1554_v31 }
  0xd9   :  { %1024 = vmatpush.bf16.msra.mxu2 %v1553_v34 }
  0xdd   :  { %1025 = vmatpush.bf16.msra.mxu2 %v1552_v39 }
 0x115   :  { %v676_v29 = vpop.f32.mrf.mxu0  ;;  %v690_v32 = vpop.f32.mrf.mxu1 }
 0x116   :  { %v677_v33 = vadd.f32 %v676_v29, %v258_v30 }
 0x118   :  { %v691_v37 = vadd.f32 %v690_v32, %v677_v33  ;;  %v1566_v32 = vld [vmem:[%s1780_s6] ss:$0 sm:$0xff] }
 0x11d   :  { %v678_v35 = vpop.f32.mrf.mxu0  ;;  %v692_v42 = vpop.f32.mrf.mxu1 }
 0x11e   :  { %v679_v40 = vadd.f32 %v678_v35, %v258_v30 }
 0x120   :  { %v693_v43 = vadd.f32 %v692_v42, %v679_v40 }
 0x122   :  { %v704_v36 = vpop.f32.mrf.mxu2  ;;  %v718_v38 = vpop.f32.mrf.mxu3 }
 0x123   :  { %v705_v41 = vadd.f32 %v704_v36, %v691_v37 }
 0x125   :  { %v719_v45 = vadd.f32 %v718_v38, %v705_v41  ;;  %v746_v53 = vpop.f32.mrf.mxu0 }
 0x126   :  { %v760_v56 = vpop.f32.mrf.mxu1 }
 0x127   :  { %v835_v50 = vmax.f32 %v719_v45, 0.0 }
 0x12a   :  { %v706_v44 = vpop.f32.mrf.mxu2  ;;  %v720_v47 = vpop.f32.mrf.mxu3 }
 0x12b   :  { %v707_v46 = vadd.f32 %v706_v44, %v693_v43 }
 0x12d   :  { %v721_v49 = vadd.f32 %v720_v47, %v707_v46  ;;  %v748_v63 = vpop.f32.mrf.mxu0 }
 0x12e   :  { %v762_v3 = vpop.f32.mrf.mxu1 }
 0x12f   :  { %v838_v51 = vmax.f32 %v721_v49, 0.0 }
 0x131   :  { %v841_v55 = vpack.c.bf16 %v838_v51, %v835_v50 }
 0x132   :  { %v774_v57 = vpop.f32.mrf.mxu2  ;;  %v732_v58 = vpop.f32.mrf.mxu3 }
 0x133   :  { %1012 = vmatmul.bf16.vlgmr.msra.gmra.mxu1 %v841_v55  ;;  %v733_v61 = vadd.f32 %v732_v58, %v259_v54 }
 0x135   :  { %v747_v62 = vadd.f32 %v746_v53, %v733_v61 }
 0x136   :  { %v816_v15 = vpop.f32.mrf.mxu0 }
 0x137   :  { %v761_v4 = vadd.f32 %v760_v56, %v747_v62  ;;  %v830_v17 = vpop.f32.mrf.mxu1 }
 0x139   :  { %v775_v8 = vadd.f32 %v774_v57, %v761_v4 }
 0x13a   :  { %v776_v1 = vpop.f32.mrf.mxu2  ;;  %v734_v2 = vpop.f32.mrf.mxu3 }
 0x13b   :  { %v735_v5 = vadd.f32 %v734_v2, %v259_v54  ;;  %v836_v14 = vmax.f32 %v775_v8, 0.0 }
 0x13d   :  { %v749_v6 = vadd.f32 %v748_v63, %v735_v5 }
 0x13e   :  { %v818_v23 = vpop.f32.mrf.mxu0 }
 0x13f   :  { %v763_v9 = vadd.f32 %v762_v3, %v749_v6  ;;  %v832_v26 = vpop.f32.mrf.mxu1 }
 0x141   :  { %v777_v10 = vadd.f32 %v776_v1, %v763_v9 }
 0x142   :  { %v788_v11 = vpop.f32.mrf.mxu2 }
 0x143   :  { %v789_v12 = vadd.f32 %v788_v11, %v260_v7  ;;  %v802_v13 = vpop.f32.mrf.mxu3  ;;  %v839_v16 = vmax.f32 %v777_v10, 0.0 }
 0x145   :  { %v842_v19 = vpack.c.bf16 %v839_v16, %v836_v14  ;;  %v803_v20 = vadd.f32 %v802_v13, %v789_v12 }
 0x147   :  { %1026 = vmatmul.bf16.vlgmr.msra.gmra.mxu2 %v842_v19  ;;  %v817_v59 = vadd.f32 %v816_v15, %v803_v20 }
 0x149   :  { %v831_v24 = vadd.f32 %v830_v17, %v817_v59 }
 0x14a   :  { %v790_v18 = vpop.f32.mrf.mxu2 }
 0x14b   :  { %v791_v0 = vadd.f32 %v790_v18, %v260_v7  ;;  %v804_v21 = vpop.f32.mrf.mxu3  ;;  %v837_v28 = vmax.f32 %v831_v24, 0.0 }
 0x14d   :  { %v805_v22 = vadd.f32 %v804_v21, %v791_v0 }
 0x14f   :  { %v819_v25 = vadd.f32 %v818_v23, %v805_v22 }
 0x151   :  { %v833_v27 = vadd.f32 %v832_v26, %v819_v25 }
 0x153   :  { %v840_v29 = vmax.f32 %v833_v27, 0.0 }
 0x155   :  { %v843_v30 = vpack.c.bf16 %v840_v29, %v837_v28 }
 0x157   :  { %1463 = vmatmul.msk.bf16.vlgmr.msra.gmra.mxu3 %vm1000_vm1, %v843_v30 }
 0x1b0   :  { %v1013_v31 = vpop.f32.mrf.mxu1 }
 0x1b1   :  { %v1014_v34 = vadd.f32 %v1566_v32, %v1013_v31 }
 0x1b8   :  { %v1015_v38 = vpop.f32.mrf.mxu1 }
 0x1b9   :  { %v1016_v40 = vadd.f32 %v1566_v32, %v1015_v38 }
 0x1ca   :  { %v1027_v33 = vpop.f32.mrf.mxu2 }
 0x1cb   :  { %v1028_v35 = vadd.f32 %v1027_v33, %v1014_v34 }
 0x1d2   :  { %v1029_v39 = vpop.f32.mrf.mxu2 }
 0x1d3   :  { %v1030_v41 = vadd.f32 %v1029_v39, %v1016_v40 }
 0x1da   :  { %v1041_v36 = vpop.f32.mrf.mxu3 }
 0x1db   :  { %v1042_v37 = vadd.f32 %v1041_v36, %v1028_v35 }
 0x1dd   :  { %1567 = vtanh.f32 %v1042_v37 }
 0x1e2   :  { %v1043_v42 = vpop.f32.mrf.mxu3 }
 0x1e3   :  { %v1568_v43 = vpop.eup %1567  ;;  %v1044_v44 = vadd.f32 %v1043_v42, %v1030_v41 }
 0x1e4   :  { %v1048_v45 = vmul.f32 2.0, %v1568_v43 }
 0x1e5   :  { %1569 = vtanh.f32 %v1044_v44 }
 0x1e6   :  { %v1050_v46 = vpack.c.bf16 %v1048_v45, %v1048_v45 }
 0x1e8   :  { %1053 = vst.msk [vmem:[%s1781_s7] sm:$0xf] %vm1052_vm2, %v1050_v46 }
 0x1eb   :  { %v1570_v47 = vpop.eup %1569 }
 0x1ec   :  { %v1049_v48 = vmul.f32 2.0, %v1570_v47 }
 0x1ee   :  { %v1051_v49 = vpack.c.bf16 %v1049_v48, %v1049_v48 }
 0x1f0   :  { %1054 = vst.msk [vmem:[%s1781_s7 + $0x4] sm:$0xf] %vm1052_vm2, %v1051_v49 }
 0x1f1   :  { %1059 = vsyncpa [#allocation3], 1 }

</bundles_post_ra>
